<compile_context>
chip_gen: v6e
topology: v6e:2x2x1
jax: 0.10.0
libtpu: 0.0.40
codegen_flags: <defaults>
</compile_context>

<pallas_src>
import jax
import jax.numpy as jnp
from jax.experimental import pallas as pl
from jax.experimental.pallas import tpu as pltpu


def _rev_add_kernel(x_ref, skip_ref, o_ref):
    # Elementwise add of the current VMEM tile (VPU; trivially mem-bound).
    o_ref[...] = x_ref[...] + skip_ref[...]


def _pick_layout(total, itemsize):
    """Choose (lane, tile_rows, grid, pad) for a flat elementwise op."""
    # Sublane packing multiple: 8 for 32-bit, 16 for 16-bit, 32 for 8-bit.
    sub = {4: 8, 2: 16, 1: 32}.get(itemsize, 8)

    # Largest lane width (multiple of 128) that divides the flat size so the
    # reshape is free.  Only if no candidate divides do we pad (to 128).
    lane = None
    for cand in (1024, 512, 256, 128):
        if total % cand == 0:
            lane = cand
            break
    pad = 0
    if lane is None:
        lane = 128
        pad = pl.cdiv(total, lane) * lane - total

    rows = (total + pad) // lane

    # ~2 MiB per block per array: big enough to amortize per-step overhead,
    # small enough that 3 arrays x 2 buffers (~12 MiB) fits every generation's
    # default scoped VMEM (v5e 16 MiB is the tightest).
    target_block_bytes = 2 * 1024 * 1024
    tile_rows = max(sub, (target_block_bytes // (lane * itemsize)) // sub * sub)

    if rows <= sub:
        # Single block spanning the full (possibly non-8-aligned) row extent.
        tile_rows = rows
    elif rows <= tile_rows:
        # Keep at least 2 grid steps so v7x's two TensorCores both get work.
        tile_rows = pl.cdiv(pl.cdiv(rows, 2), sub) * sub

    grid = pl.cdiv(rows, tile_rows)
    return lane, tile_rows, grid, pad


def rev_add(x, skip):
    """Pallas implementation of RevAdd.forward: out = x + skip."""
    out_dtype = jnp.result_type(x.dtype, skip.dtype)
    if skip.shape != x.shape:
        # Match broadcasting semantics of `x + skip`.
        skip = jnp.broadcast_to(skip, x.shape)
    x = x.astype(out_dtype)
    skip = skip.astype(out_dtype)

    orig_shape = x.shape
    total = x.size
    itemsize = jnp.dtype(out_dtype).itemsize

    lane, tile_rows, grid, pad = _pick_layout(total, itemsize)
    rows = (total + pad) // lane

    # Flatten (free reshape); pad only in the rare non-128-aligned case.
    xf = x.reshape(-1)
    sf = skip.reshape(-1)
    if pad:
        xf = jnp.pad(xf, (0, pad))
        sf = jnp.pad(sf, (0, pad))
    x2 = xf.reshape(rows, lane)
    s2 = sf.reshape(rows, lane)

    out2 = pl.pallas_call(
        _rev_add_kernel,
        out_shape=jax.ShapeDtypeStruct((rows, lane), out_dtype),
        grid=(grid,),
        in_specs=[
            pl.BlockSpec((tile_rows, lane), lambda i: (i, 0)),
            pl.BlockSpec((tile_rows, lane), lambda i: (i, 0)),
        ],
        out_specs=pl.BlockSpec((tile_rows, lane), lambda i: (i, 0)),
        compiler_params=pltpu.CompilerParams(
            dimension_semantics=("parallel",)),
        cost_estimate=pl.CostEstimate(
            flops=total,
            transcendentals=0,
            bytes_accessed=3 * total * itemsize),
    )(x2, s2)

    if pad:
        return out2.reshape(-1)[:total].reshape(orig_shape)
    return out2.reshape(orig_shape)


class RevAdd:
    """JAX mirror of the PyTorch RevAdd module (forward semantics only)."""

    def __init__(self, invert=True):
        self.set_invert(invert)
        self.skip = None

    def set_invert(self, invert):
        self.invert = invert

    def register_skip(self, skip):
        self.skip = skip
        # Torch's `skip + 0` just makes a fresh copy; JAX arrays are immutable
        # so returning the array is functionally identical.
        return skip

    def forward(self, x):
        # TODO(synk): the backward hook / x.data.set_() storage-release trick
        # is reversible-training autograd machinery with no forward-compute
        # Pallas equivalent.
        return rev_add(x, self.skip)


if __name__ == "__main__":
    key = jax.random.PRNGKey(0)
    kx, ks = jax.random.split(key)
    x = jax.random.normal(kx, (2, 4, 16, 16), dtype=jnp.float32)
    skip = jax.random.normal(ks, (2, 4, 16, 16), dtype=jnp.float32)

    mod = RevAdd(invert=True)
    mod.register_skip(skip)
    out = mod.forward(x)
    out = jax.block_until_ready(out)

    ref = x + skip
    assert out.shape == x.shape and out.dtype == x.dtype
    assert jnp.allclose(out, ref, atol=1e-6, rtol=1e-6)
    print("KERNEL_OK")
</pallas_src>

<mosaic_0001>
module attributes {stable_mosaic.version = 11 : i64} {
  func.func @_rev_add_kernel(%arg0: i32, %arg1: memref<2x1024xf32, #tpu.memory_space<vmem>>, %arg2: memref<2x1024xf32, #tpu.memory_space<vmem>>, %arg3: memref<2x1024xf32, #tpu.memory_space<vmem>>) attributes {dimension_semantics = [#tpu.dimension_semantics<parallel>], iteration_bounds = array<i64: 1>, scalar_prefetch = 0 : i64, scratch_operands = 0 : i64, tpu.core_type = #tpu.core_type<tc>, window_params = [{transform_indices = @transform_0, window_bounds = array<i64: 2, 1024>}, {transform_indices = @transform_1, window_bounds = array<i64: 2, 1024>}, {transform_indices = @transform_2, window_bounds = array<i64: 2, 1024>}]} {
    %c0 = arith.constant 0 : index
    %c0_0 = arith.constant 0 : index
    %0 = vector.load %arg1[%c0, %c0_0] : memref<2x1024xf32, #tpu.memory_space<vmem>>, vector<2x1024xf32>
    %c0_1 = arith.constant 0 : index
    %c0_2 = arith.constant 0 : index
    %1 = vector.load %arg2[%c0_1, %c0_2] : memref<2x1024xf32, #tpu.memory_space<vmem>>, vector<2x1024xf32>
    %2 = arith.addf %0, %1 : vector<2x1024xf32>
    %c0_3 = arith.constant 0 : index
    %c0_4 = arith.constant 0 : index
    %3 = vector.load %arg3[%c0_3, %c0_4] : memref<2x1024xf32, #tpu.memory_space<vmem>>, vector<2x1024xf32>
    tpu.vector_store %arg3[%c0_3, %c0_4], %2 {strides = array<i32>} : memref<2x1024xf32, #tpu.memory_space<vmem>>, vector<2x1024xf32>,
    return
  }
  func.func @transform_0(%arg0: i32) -> (i32, i32) {
    %c0_i32 = arith.constant 0 : i32
    %c0_i32_0 = arith.constant 0 : i32
    return %arg0, %c0_i32 : i32, i32
  }
  func.func @transform_1(%arg0: i32) -> (i32, i32) {
    %c0_i32 = arith.constant 0 : i32
    %c0_i32_0 = arith.constant 0 : i32
    return %arg0, %c0_i32 : i32, i32
  }
  func.func @transform_2(%arg0: i32) -> (i32, i32) {
    %c0_i32 = arith.constant 0 : i32
    %c0_i32_0 = arith.constant 0 : i32
    return %arg0, %c0_i32 : i32, i32
  }
}

</mosaic_0001>

<bundles_post_ra>
// kernel: tpu_custom_call.1
= control target key start
LH: loop header
LB: loop body
LE: loop exit
PB: predicated region body
PF: predicated region fallthrough
CT: control target
= control target key end

     0   :  { %7 = vsyncpa [#allocation3], 0  ;;  %s156_s0 = inlined_call_operand.hbm [shape: f32[2,1024], index: 0, kind: input, shape index: {}]   ;;  %s157_s1 = inlined_call_operand.hbm [shape: f32[2,1024], index: 1, kind: input, shape index: {}]   ;;  %s158_s2 = inlined_call_operand.hbm [shape: f32[2,1024], index: 2, kind: output, shape index: {}]  }
   0x1   :  { %8 = vsyncpa [#allocation6], 0 }
   0x2   :  { %9 = vsyncpa [#allocation4], 0  ;;  %s129_s9 = smov [#allocation2]   ;;  %s130_s11 = smov [#allocation5]  }
   0x3   :  { %s16_s10 = sshll.u32 %s129_s9, 4  ;;  %s26_s12 = sshll.u32 %s130_s11, 4  ;;  %s17_s10 = int_to_ptr.vmem [resolvable:$true] %s16_s10  ;;  %s27_s12 = int_to_ptr.vmem [resolvable:$true] %s26_s12 }
   0x4   :  { %s71_s13 = scalar_lea.vmem %s17_s10, 256  ;;  %p76_p1 = scmp.lt.s32.totalorder %s17_s10, %s17_s10 }
   0x5   :  { %p72_p0 = scmp.ne.s32.totalorder %s17_s10, %s71_s13  ;;  %p77_p2 = scmp.lt.s32.totalorder %s71_s13, %s71_s13 }
   0x7   :  { %p78_p3 = por %p77_p2, %p76_p1 }
   0x9   :  { %p79_p4 = pnand %p78_p3, %p72_p0 }
   0xb   :  { %82 = shalt.err (!%p79_p4)
}
   0xc   :  { %19 = dma.hbm_to_vmem [thread:$0]  %s156_s0, 256, %s17_s10, [#allocation3]  }
   0xd   :  { %s91_s16 = scalar_lea.vmem %s27_s12, 256  ;;  %p96_p6 = scmp.lt.s32.totalorder %s27_s12, %s27_s12 }
   0xe   :  { %p92_p5 = scmp.ne.s32.totalorder %s27_s12, %s91_s16  ;;  %p97_p7 = scmp.lt.s32.totalorder %s91_s16, %s91_s16 }
  0x10   :  { %p98_p8 = por %p97_p7, %p96_p6 }
  0x12   :  { %p99_p9 = pnand %p98_p8, %p92_p5 }
  0x14   :  { %102 = shalt.err (!%p99_p9)
}
  0x15   :  { %29 = dma.hbm_to_vmem [thread:$0]  %s157_s1, 256, %s27_s12, [#allocation6]  }
  0x16   :  { %123 = dma.done.wait [#allocation3], 256  }
  0x17   :  { %124 = vsyncadd [#allocation3], 4294967040 }
  0x18   :  { %125 = dma.done.wait [#allocation6], 256  }
  0x19   :  { %126 = vsyncadd [#allocation6], 4294967040  ;;  %s131_s19 = smov [#allocation7]   ;;  %v36_v0 = vld [vmem:[#allocation2] sm:$0xff]  ;;  %v38_v1 = vld [vmem:[#allocation5] sm:$0xff] }
  0x1a   :  { %s50_s20 = sshll.u32 %s131_s19, 4  ;;  %v37_v2 = vld [vmem:[#allocation2 + $0x8] sm:$0xff]  ;;  %v40_v3 = vadd.f32 %v38_v1, %v36_v0  ;;  %v39_v4 = vld [vmem:[#allocation5 + $0x8] sm:$0xff]  ;;  %s51_s20 = int_to_ptr.vmem [resolvable:$true] %s50_s20 }
  0x1b   :  { %v41_v5 = vadd.f32 %v39_v4, %v37_v2  ;;  %s103_s0 = scalar_lea.vmem %s51_s20, 256  ;;  %p108_p11 = scmp.lt.s32.totalorder %s51_s20, %s51_s20 }
  0x1c   :  { %42 = vst [vmem:[#allocation7] sm:$0xff] %v40_v3  ;;  %p104_p10 = scmp.ne.s32.totalorder %s51_s20, %s103_s0  ;;  %p109_p12 = scmp.lt.s32.totalorder %s103_s0, %s103_s0 }
  0x1d   :  { %43 = vst [vmem:[#allocation7 + $0x8] sm:$0xff] %v41_v5 }
  0x1e   :  { %p110_p13 = por %p109_p12, %p108_p11 }
  0x20   :  { %p111_p0 = pnand %p110_p13, %p104_p10 }
  0x22   :  { %114 = shalt.err (!%p111_p0)
}
  0x23   :  { %53 = dma.vmem_to_hbm [thread:$0]  %s51_s20, 256, %s158_s2, [#allocation4]  }
  0x24   :  { %127 = dma.done.wait [#allocation4], 256  }
  0x25   :  { %128 = vsyncadd [#allocation4], 4294967040 }
  0x26   :  { %57 = vsyncpa [#allocation3], 1 }
  0x27   :  { %58 = vsyncpa [#allocation6], 1 }
  0x28   :  { %59 = vsyncpa [#allocation4], 1 }

</bundles_post_ra>
